<compile_context>
chip_gen: v7x
topology: tpu7x:2x2x1
jax: 0.10.0
libtpu: 0.0.40
codegen_flags: <defaults>
</compile_context>

<pallas_src>
import functools

import jax
import jax.numpy as jnp
from jax.experimental import pallas as pl
from jax.experimental.pallas import tpu as pltpu


def _round_up(x, m):
    return ((x + m - 1) // m) * m


def _d_celoss_kernel(pred_ref, tgt_ref, sum_ref, cnt_ref, *, hw, tile_hw,
                     needs_bounds):
    """One (batch b, spatial-tile j) grid step.

    pred_ref: (1, C, tile_hw)  logits, classes on sublanes, pixels on lanes
    tgt_ref : (1, 1, tile_hw)  int32 labels
    sum_ref : (1, 1, tile_hw)  per-lane masked-NLL partials (resident per b)
    cnt_ref : (1, 1, tile_hw)  per-lane valid-pixel partials (resident per b)
    """
    j = pl.program_id(1)

    @pl.when(j == 0)
    def _():
        sum_ref[...] = jnp.zeros_like(sum_ref)
        cnt_ref[...] = jnp.zeros_like(cnt_ref)

    logits = pred_ref[0].astype(jnp.float32)        # (C, tile_hw)
    tgt = tgt_ref[0]                                # (1, tile_hw) int32
    c = logits.shape[0]

    valid = jnp.logical_and(tgt >= 0, tgt <= 70)
    if needs_bounds:
        # In-bounds mask only for a ragged last spatial tile (trace-time gated).
        lane_pos = jax.lax.broadcasted_iota(jnp.int32, (1, tile_hw), 1)
        valid = jnp.logical_and(valid, (j * tile_hw + lane_pos) < hw)
    safe_tgt = jnp.where(valid, tgt, 0)             # keep class index in range

    # Numerically stable logsumexp along the class (sublane) axis.
    m = jnp.max(logits, axis=0, keepdims=True)                       # (1, tile_hw)
    lse = m + jnp.log(jnp.sum(jnp.exp(logits - m), axis=0, keepdims=True))

    # Gather the target-class logit via a class-iota compare (C on sublanes).
    class_iota = jax.lax.broadcasted_iota(jnp.int32, (c, tile_hw), 0)
    tgt_logit = jnp.sum(jnp.where(class_iota == safe_tgt, logits, 0.0),
                        axis=0, keepdims=True)                       # (1, tile_hw)

    nll = lse - tgt_logit                                            # (1, tile_hw)

    # Lane-dense elementwise accumulation (no per-step cross-lane reduce).
    sum_ref[0] += jnp.where(valid, nll, 0.0)
    cnt_ref[0] += valid.astype(jnp.float32)


def d_celoss(pred_nchw, target_nhw, *, tile_hw=8192):
    """pred_nchw: (N, C, H, W) float; target_nhw: (N, H, W) int. Returns scalar f32."""
    n, c, h, w = pred_nchw.shape
    hw = h * w

    # Free, contiguous reshapes (no transpose, no extra HBM pass).
    pred = pred_nchw.reshape(n, c, hw)
    tgt = target_nhw.reshape(n, 1, hw).astype(jnp.int32)

    # Spatial tile: multiple of 128 lanes, capped so a single block covers small HW.
    tile_hw = min(tile_hw, _round_up(hw, 128))
    num_tiles = pl.cdiv(hw, tile_hw)
    needs_bounds = (hw % tile_hw) != 0

    kernel = functools.partial(_d_celoss_kernel, hw=hw, tile_hw=tile_hw,
                               needs_bounds=needs_bounds)

    sums, cnts = pl.pallas_call(
        kernel,
        out_shape=(
            jax.ShapeDtypeStruct((n, 1, tile_hw), jnp.float32),   # per-batch NLL partials
            jax.ShapeDtypeStruct((n, 1, tile_hw), jnp.float32),   # per-batch count partials
        ),
        grid_spec=pltpu.PrefetchScalarGridSpec(
            num_scalar_prefetch=0,
            grid=(n, num_tiles),
            in_specs=[
                pl.BlockSpec((1, c, tile_hw), lambda b, j: (b, 0, j)),
                pl.BlockSpec((1, 1, tile_hw), lambda b, j: (b, 0, j)),
            ],
            out_specs=[
                pl.BlockSpec((1, 1, tile_hw), lambda b, j: (b, 0, 0)),
                pl.BlockSpec((1, 1, tile_hw), lambda b, j: (b, 0, 0)),
            ],
        ),
        compiler_params=pltpu.CompilerParams(
            dimension_semantics=("parallel", "arbitrary"),
        ),
    )(pred, tgt)

    # Tiny final tree-reduce + divide in plain JAX (N * tile_hw f32 each).
    return jnp.sum(sums) / jnp.sum(cnts)


def _reference(pred_nchw, target_nhw):
    """Pure-JAX reference mirroring the PyTorch module."""
    n, c, h, w = pred_nchw.shape
    pred_flat = jnp.transpose(pred_nchw, (0, 2, 3, 1)).reshape(-1, c).astype(jnp.float32)
    tgt_flat = target_nhw.reshape(-1)
    msk = jnp.logical_and(tgt_flat >= 0, tgt_flat <= 70)
    safe_tgt = jnp.where(msk, tgt_flat, 0)
    lse = jax.scipy.special.logsumexp(pred_flat, axis=-1)
    tgt_logit = jnp.take_along_axis(pred_flat, safe_tgt[:, None], axis=-1)[:, 0]
    nll = lse - tgt_logit
    mskf = msk.astype(jnp.float32)
    return jnp.sum(nll * mskf) / jnp.sum(mskf)


if __name__ == "__main__":
    key = jax.random.PRNGKey(0)
    k_pred, k_tgt = jax.random.split(key)

    # small shapes: batch=2, classes=71 (labels 0..70 valid), spatial 16x16
    N, C, H, W = 2, 71, 16, 16
    pred = jax.random.normal(k_pred, (N, C, H, W), dtype=jnp.float32)
    # labels in [-5, 76): some out-of-range to exercise the mask
    target = jax.random.randint(k_tgt, (N, H, W), minval=-5, maxval=76, dtype=jnp.int32)

    loss = jax.block_until_ready(d_celoss(pred, target))
    ref = jax.block_until_ready(_reference(pred, target))

    assert jnp.allclose(loss, ref, rtol=1e-5, atol=1e-5), (loss, ref)
    print("KERNEL_OK")
</pallas_src>

<mosaic_0001>
module attributes {stable_mosaic.version = 11 : i64} {
  func.func @_d_celoss_kernel(%arg0: i32, %arg1: i32, %arg2: memref<1x71x256xf32, #tpu.memory_space<vmem>>, %arg3: memref<1x1x256xi32, #tpu.memory_space<vmem>>, %arg4: memref<1x1x256xf32, #tpu.memory_space<vmem>>, %arg5: memref<1x1x256xf32, #tpu.memory_space<vmem>>) attributes {dimension_semantics = [#tpu.dimension_semantics<parallel>, #tpu.dimension_semantics<arbitrary>], iteration_bounds = array<i64: 2, 1>, scalar_prefetch = 0 : i64, scratch_operands = 0 : i64, tpu.core_type = #tpu.core_type<tc>, window_params = [{transform_indices = @transform_0, window_bounds = array<i64: 1, 71, 256>}, {transform_indices = @transform_1, window_bounds = array<i64: 1, 1, 256>}, {transform_indices = @transform_2, window_bounds = array<i64: 1, 1, 256>}, {transform_indices = @transform_3, window_bounds = array<i64: 1, 1, 256>}]} {
    %c0_i32 = arith.constant 0 : i32
    %0 = arith.cmpi eq, %arg1, %c0_i32 : i32
    %1 = arith.extui %0 : i1 to i32
    %c0_i32_0 = arith.constant 0 : i32
    %2 = arith.cmpi ne, %1, %c0_i32_0 : i32
    scf.if %2 {
      %cst_24 = arith.constant 0.000000e+00 : f32
      %47 = vector.broadcast %cst_24 : f32 to vector<1x1x256xf32>
      %c0_25 = arith.constant 0 : index
      %c0_26 = arith.constant 0 : index
      %c0_27 = arith.constant 0 : index
      %48 = vector.load %arg4[%c0_25, %c0_26, %c0_27] : memref<1x1x256xf32, #tpu.memory_space<vmem>>, vector<1x1x256xf32>
      tpu.vector_store %arg4[%c0_25, %c0_26, %c0_27], %47 {strides = array<i32>} : memref<1x1x256xf32, #tpu.memory_space<vmem>>, vector<1x1x256xf32>,
      %cst_28 = arith.constant 0.000000e+00 : f32
      %49 = vector.broadcast %cst_28 : f32 to vector<1x1x256xf32>
      %c0_29 = arith.constant 0 : index
      %c0_30 = arith.constant 0 : index
      %c0_31 = arith.constant 0 : index
      %50 = vector.load %arg5[%c0_29, %c0_30, %c0_31] : memref<1x1x256xf32, #tpu.memory_space<vmem>>, vector<1x1x256xf32>
      tpu.vector_store %arg5[%c0_29, %c0_30, %c0_31], %49 {strides = array<i32>} : memref<1x1x256xf32, #tpu.memory_space<vmem>>, vector<1x1x256xf32>,
    } else {
    }
    %c0 = arith.constant 0 : index
    %c0_1 = arith.constant 0 : index
    %c0_2 = arith.constant 0 : index
    %3 = vector.load %arg2[%c0, %c0_1, %c0_2] : memref<1x71x256xf32, #tpu.memory_space<vmem>>, vector<1x71x256xf32>
    %4 = vector.shape_cast %3 : vector<1x71x256xf32> to vector<71x256xf32>
    %c0_3 = arith.constant 0 : index
    %c0_4 = arith.constant 0 : index
    %c0_5 = arith.constant 0 : index
    %5 = vector.load %arg3[%c0_3, %c0_4, %c0_5] : memref<1x1x256xi32, #tpu.memory_space<vmem>>, vector<1x1x256xi32>
    %6 = vector.shape_cast %5 : vector<1x1x256xi32> to vector<1x256xi32>
    %c0_i32_6 = arith.constant 0 : i32
    %7 = vector.broadcast %c0_i32_6 : i32 to vector<1x256xi32>
    %8 = arith.cmpi sge, %6, %7 : vector<1x256xi32>
    %c70_i32 = arith.constant 70 : i32
    %9 = vector.broadcast %c70_i32 : i32 to vector<1x256xi32>
    %10 = arith.cmpi sle, %6, %9 : vector<1x256xi32>
    %11 = arith.andi %8, %10 : vector<1x256xi1>
    %c0_i32_7 = arith.constant 0 : i32
    %12 = vector.broadcast %c0_i32_7 : i32 to vector<1x256xi32>
    %13 = arith.select %11, %6, %12 : vector<1x256xi1>, vector<1x256xi32>
    %cst = arith.constant dense<0xFF800000> : vector<256xf32>
    %14 = vector.multi_reduction <maximumf>, %4, %cst [0] : vector<71x256xf32> to vector<256xf32>
    %15 = vector.shape_cast %14 : vector<256xf32> to vector<1x256xf32>
    %16 = vector.broadcast %15 : vector<1x256xf32> to vector<71x256xf32>
    %17 = arith.subf %4, %16 : vector<71x256xf32>
    %18 = math.exp %17 : vector<71x256xf32>
    %cst_8 = arith.constant dense<0.000000e+00> : vector<256xf32>
    %19 = vector.multi_reduction <add>, %18, %cst_8 [0] : vector<71x256xf32> to vector<256xf32>
    %20 = vector.shape_cast %19 : vector<256xf32> to vector<1x256xf32>
    %21 = math.log %20 : vector<1x256xf32>
    %22 = arith.addf %15, %21 : vector<1x256xf32>
    %23 = tpu.iota {dimensions = array<i32: 0>} : vector<71x256xi32>
    %24 = vector.broadcast %13 : vector<1x256xi32> to vector<71x256xi32>
    %25 = arith.cmpi eq, %23, %24 : vector<71x256xi32>
    %cst_9 = arith.constant 0.000000e+00 : f32
    %26 = vector.broadcast %cst_9 : f32 to vector<71x256xf32>
    %27 = arith.select %25, %4, %26 : vector<71x256xi1>, vector<71x256xf32>
    %cst_10 = arith.constant dense<0.000000e+00> : vector<256xf32>
    %28 = vector.multi_reduction <add>, %27, %cst_10 [0] : vector<71x256xf32> to vector<256xf32>
    %29 = vector.shape_cast %28 : vector<256xf32> to vector<1x256xf32>
    %30 = arith.subf %22, %29 : vector<1x256xf32>
    %c0_11 = arith.constant 0 : index
    %c0_12 = arith.constant 0 : index
    %c0_13 = arith.constant 0 : index
    %31 = vector.load %arg4[%c0_11, %c0_12, %c0_13] : memref<1x1x256xf32, #tpu.memory_space<vmem>>, vector<1x1x256xf32>
    %32 = vector.shape_cast %31 : vector<1x1x256xf32> to vector<1x256xf32>
    %cst_14 = arith.constant 0.000000e+00 : f32
    %33 = vector.broadcast %cst_14 : f32 to vector<1x256xf32>
    %34 = arith.select %11, %30, %33 : vector<1x256xi1>, vector<1x256xf32>
    %35 = arith.addf %32, %34 : vector<1x256xf32>
    %c0_15 = arith.constant 0 : index
    %c0_16 = arith.constant 0 : index
    %c0_17 = arith.constant 0 : index
    %36 = vector.load %arg4[%c0_15, %c0_16, %c0_17] : memref<1x1x256xf32, #tpu.memory_space<vmem>>, vector<1x1x256xf32>
    %37 = vector.shape_cast %36 : vector<1x1x256xf32> to vector<1x256xf32>
    %38 = vector.shape_cast %35 : vector<1x256xf32> to vector<1x1x256xf32>
    tpu.vector_store %arg4[%c0_15, %c0_16, %c0_17], %38 {strides = array<i32>} : memref<1x1x256xf32, #tpu.memory_space<vmem>>, vector<1x1x256xf32>,
    %c0_18 = arith.constant 0 : index
    %c0_19 = arith.constant 0 : index
    %c0_20 = arith.constant 0 : index
    %39 = vector.load %arg5[%c0_18, %c0_19, %c0_20] : memref<1x1x256xf32, #tpu.memory_space<vmem>>, vector<1x1x256xf32>
    %40 = vector.shape_cast %39 : vector<1x1x256xf32> to vector<1x256xf32>
    %41 = arith.extui %11 : vector<1x256xi1> to vector<1x256xi32>
    %42 = arith.sitofp %41 : vector<1x256xi32> to vector<1x256xf32>
    %43 = arith.addf %40, %42 : vector<1x256xf32>
    %c0_21 = arith.constant 0 : index
    %c0_22 = arith.constant 0 : index
    %c0_23 = arith.constant 0 : index
    %44 = vector.load %arg5[%c0_21, %c0_22, %c0_23] : memref<1x1x256xf32, #tpu.memory_space<vmem>>, vector<1x1x256xf32>
    %45 = vector.shape_cast %44 : vector<1x1x256xf32> to vector<1x256xf32>
    %46 = vector.shape_cast %43 : vector<1x256xf32> to vector<1x1x256xf32>
    tpu.vector_store %arg5[%c0_21, %c0_22, %c0_23], %46 {strides = array<i32>} : memref<1x1x256xf32, #tpu.memory_space<vmem>>, vector<1x1x256xf32>,
    return
  }
  func.func @transform_0(%arg0: i32, %arg1: i32) -> (i32, i32, i32) {
    %c0_i32 = arith.constant 0 : i32
    %c0_i32_0 = arith.constant 0 : i32
    return %arg0, %c0_i32, %arg1 : i32, i32, i32
  }
  func.func @transform_1(%arg0: i32, %arg1: i32) -> (i32, i32, i32) {
    %c0_i32 = arith.constant 0 : i32
    %c0_i32_0 = arith.constant 0 : i32
    return %arg0, %c0_i32, %arg1 : i32, i32, i32
  }
  func.func @transform_2(%arg0: i32, %arg1: i32) -> (i32, i32, i32) {
    %c0_i32 = arith.constant 0 : i32
    %c0_i32_0 = arith.constant 0 : i32
    %c0_i32_1 = arith.constant 0 : i32
    return %arg0, %c0_i32, %c0_i32_0 : i32, i32, i32
  }
  func.func @transform_3(%arg0: i32, %arg1: i32) -> (i32, i32, i32) {
    %c0_i32 = arith.constant 0 : i32
    %c0_i32_0 = arith.constant 0 : i32
    %c0_i32_1 = arith.constant 0 : i32
    return %arg0, %c0_i32, %c0_i32_0 : i32, i32, i32
  }
}

</mosaic_0001>

<bundles_post_ra>
// kernel: tpu_custom_call.1
= control target key start
LH: loop header
LB: loop body
LE: loop exit
PB: predicated region body
PF: predicated region fallthrough
CT: control target
= control target key end

     0   :  { %9 = vsyncpa [#allocation3], 0  ;;  %s1317_s0 = inlined_call_operand.vmem [shape: f32[2,71,256], index: 0, kind: input, shape index: {}]   ;;  %s1318_s1 = inlined_call_operand.vmem [shape: s32[2,1,256], index: 1, kind: input, shape index: {}]   ;;  %s1319_s2 = inlined_call_operand.hbm [shape: f32[2,1,256], index: 2, kind: output, shape index: {0}]   ;;  %s1320_s3 = inlined_call_operand.hbm [shape: f32[2,1,256], index: 3, kind: output, shape index: {1}]  }
   0x1   :  { %11 = vsyncpa [#allocation3 + $0x1], 0 }
   0x2   :  { %12 = vsyncpa [#allocation5], 0 }
   0x3   :  { %14 = vsyncpa [#allocation5 + $0x1], 0  ;;  %s925_s12 = smov 0   ;;  %s927_s13 = smov 0  }
   0x4   :  { %s929_s14 = smov 0   ;;  %s931_s15 = smov 0  }
   0x5   :  { %s933_s16 = smov 0   ;;  %s935_s17 = smov 0  }
   0x6 LB: > { %s666_s18 = sadd.s32 4294967295, %s899_s17   ;;  %s667_s19 = sadd.s32 4294967294, %s899_s17   ;;  %s899_s17 = sphi %s935_s17, %s20_s17   ;;  %s895_s16 = sphi %s933_s16, %s1331_s16   ;;  %s891_s15 = sphi %s931_s15, %s1330_s15   ;;  %s887_s14 = sphi %s929_s14, %s1329_s14   ;;  %s883_s13 = sphi %s927_s13, %s1328_s13   ;;  %s879_s12 = sphi %s925_s12, %s1327_s12  }
   0x7   : > { %s32_s20 = sadd.s32 1, %s895_s16  ;;  %s95_s21 = sadd.s32 1, %s887_s14 }
   0x8   : > { %p34_p0 = scmp.ge.s32.totalorder %s32_s20, 2  ;;  %p105_p1 = scmp.ne.s32.totalorder %s887_s14, %s883_s13 }
   0x9   : > { %p106_p2 = scmp.eq.s32.totalorder %s666_s18, 1  ;;  %p111_p3 = scmp.ne.s32.totalorder %s883_s13, %s879_s12 }
   0xa   : > { %s1333_s20 = smov (%p34_p0, %s32_s20), 0  ;;  %p112_p5 = scmp.eq.s32.totalorder %s667_s19, 1 }
   0xb   : > { %p965_p4 = por %p106_p2, %p105_p1  ;;  %s92_s23 = ssub.s32 %s895_s16, %s1333_s20 }
   0xc   : > { %p670_p6 = scmp.ge.s32.totalorder %s899_s17, 1  ;;  %p93_p7 = scmp.eq.s32.totalorder %s92_s23, 0 }
   0xd   : > { %p972_p8 = por %p112_p5, %p111_p3  ;;  %p181_p9 = scmp.lt.s32.totalorder %s899_s17, 3 }
   0xe   : > { %s978_s25 = scalar_select %p93_p7, %s887_s14, %s95_s21  }
   0xf   : > { %p182_p10 = pnand %p670_p6, %p181_p9 }
  0x10   : > { %s981_s26 = sand.u32 (!%p182_p10), 1, %s883_s13   ;;  %p223_p11 = scmp.lt.s32.totalorder (!%p182_p10), %s891_s15, 1  ;;  %v245_v0 = vlaneseq (!%p182_p10)  ;;  %v901_v2 = vmov (!%p182_p10), 0.0   ;;  %vm280_vm1 = vcmask (!%p182_p10), 1046528  }
  0x11   : > { %185 = sbr.rel (%p182_p10) target bundleno = 153 (0x99), region = 28  ;;  %s671_s27 = sshll.u32 (!%p182_p10), %s981_s26, 1 }
  0x12   : > { %vm985_vm0 = vcmp.lt.s32.totalorder (!%p182_p10), %v245_v0, 256  ;;  %s992_s29 = scalar_lea.vmem (!%p182_p10), [#allocation2], %s671_s27  ;;  %s997_s30 = scalar_lea.vmem (!%p182_p10), [#allocation4], %s671_s27  ;;  %v1066_v40 = vshrl.u32 (!%p182_p10), %v245_v0, 7 }
  0x13   : > { %249 = vst.msk [vmem:[%s992_s29] sm:$0x3] (!%p182_p10), %vm985_vm0, %v901_v2  ;;  %250 = vst.msk [vmem:[%s997_s30] sm:$0x3] (!%p182_p10), %vm985_vm0, %v901_v2  ;;  %s684_s18 = sshll.u32 (!%p182_p10), %s891_s15, 5  ;;  %s546_s19 = sshll.u32 (!%p182_p10), %s997_s30, 4  ;;  %s1095_s19 = int_to_ptr.vmem [resolvable:$true] %s546_s19 }
  0x14   : > { %v407_v46 = vsub.s32 (!%p182_p10), 0, %v1066_v40  ;;  %v411_v47 = vsub.s32 (!%p182_p10), 1, %v1066_v40  ;;  %v1082_v55 = vadd.s32 (!%p182_p10), 8, %v1066_v40  ;;  %s1093_s27 = scalar_lea.hbm (!%p182_p10), %s1320_s3, %s684_s18  ;;  %v1100_v62 = vadd.s32 (!%p182_p10), 16, %v1066_v40  ;;  %s902_s5 = smov (!%p182_p10), [#allocation4]  }
  0x15   : > { %v1103_v63 = vadd.s32 (!%p182_p10), 24, %v1066_v40  ;;  %s793_s6 = sshll.u32 (!%p182_p10), %s902_s5, 4  ;;  %s794_s6 = int_to_ptr.vmem [resolvable:$false] %s793_s6 }
  0x16   : > { %p796_p1 = scmp.lt.s32.totalorder (!%p182_p10), %s1095_s19, %s794_s6 }
  0x18   : > { %s990_s28 = scalar_select %p223_p11, %s891_s15, 1 }
  0x1a   : > { %s686_s4 = smul.u32 144, %s990_s28  ;;  %s674_s8 = sshll.u32 %s990_s28, 1  ;;  %v507_v52 = vld [vmem:[%s997_s30] sm:$0x3] }
  0x1b   : > { %s239_s11 = scalar_lea.vmem %s1318_s1, %s674_s8  ;;  %s518_s28 = scalar_lea.sflag [#allocation5], %s981_s26 }
  0x1c   : > { %s230_s7 = scalar_lea.vmem %s1317_s0, %s686_s4  ;;  %v269_v34 = vld [vmem:[%s239_s11] sm:$0x3]  ;;  %s789_s4 = scalar_lea.vmem %s1095_s19, 32 }
  0x1d   : > { %v1006_v3 = vld [vmem:[%s230_s7] sm:$0xff]  ;;  %v1008_v4 = vld [vmem:[%s230_s7 + $0x8] sm:$0xff]  ;;  %v1010_v5 = vld [vmem:[%s230_s7 + $0x10] sm:$0xff]  ;;  %vm270_vm2 = vcmp.ge.s32.totalorder %v269_v34, 0  ;;  %vm271_vm3 = vcmp.le.s32.totalorder %v269_v34, 70  ;;  %p790_p12 = scmp.ne.s32.totalorder %s1095_s19, %s789_s4 }
  0x1e   : > { %v1012_v6 = vld [vmem:[%s230_s7 + $0x18] sm:$0xff]  ;;  %v1014_v7 = vld [vmem:[%s230_s7 + $0x20] sm:$0xff]  ;;  %v1017_v8 = vld [vmem:[%s230_s7 + $0x28] sm:$0xff] }
  0x1f   : > { %v1019_v9 = vld [vmem:[%s230_s7 + $0x30] sm:$0xff]  ;;  %v1021_v10 = vld [vmem:[%s230_s7 + $0x38] sm:$0xff]  ;;  %v274_v11 = vmax.f32 %v1006_v3, %v1014_v7  ;;  %v1025_v12 = vld [vmem:[%s230_s7 + $0x40] sm:$0xff]  ;;  %v290_v16 = vmax.f32 %v1008_v4, %v1017_v8  ;;  %p791_p13 = pnand %p790_p12, %p965_p4 }
  0x20   : > { %v1027_v13 = vld [vmem:[%s230_s7 + $0x48] sm:$0xff]  ;;  %v1029_v14 = vld [vmem:[%s230_s7 + $0x50] sm:$0xff]  ;;  %v275_v15 = vmax.f32 %v1010_v5, %v1019_v9  ;;  %v1035_v17 = vld [vmem:[%s230_s7 + $0x58] sm:$0xff]  ;;  %v291_v21 = vmax.f32 %v1012_v6, %v1021_v10 }
  0x21   : > { %v1037_v18 = vld [vmem:[%s230_s7 + $0x60] sm:$0xff]  ;;  %v1039_v19 = vld [vmem:[%s230_s7 + $0x68] sm:$0xff]  ;;  %v276_v20 = vmax.f32 %v274_v11, %v1025_v12  ;;  %v1047_v22 = vld [vmem:[%s230_s7 + $0x70] sm:$0xff]  ;;  %v292_v26 = vmax.f32 %v290_v16, %v1027_v13  ;;  %v1114_v11 = vadd.s32 40, %v1066_v40  ;;  %p792_p0 = pneg %p791_p13 }
  0x22   : > { %v1049_v23 = vld [vmem:[%s230_s7 + $0x78] sm:$0xff]  ;;  %v1051_v24 = vld [vmem:[%s230_s7 + $0x80] sm:$0x7f]  ;;  %v277_v25 = vmax.f32 %v275_v15, %v1029_v14  ;;  %v1055_v27 = vld [vmem:[%s230_s7 + $0x88] sm:$0x7f]  ;;  %v293_v30 = vmax.f32 %v291_v21, %v1035_v17  ;;  %v1117_v15 = vadd.s32 48, %v1066_v40 }
  0x23   : > { %v278_v28 = vmax.f32 %v276_v20, %v1037_v18  ;;  %v281_v29 = vsel %vm280_vm1, %v1051_v24, -inf  ;;  %v294_v32 = vmax.f32 %v292_v26, %v1039_v19  ;;  %v296_v33 = vsel %vm280_vm1, %v1055_v27, -inf  ;;  %vm1068_vm4 = vmand %vm270_vm2, %vm271_vm3 }
  0x24   : > { %v279_v31 = vmax.f32 %v277_v25, %v1047_v22  ;;  %v295_v36 = vmax.f32 %v293_v30, %v1049_v23  ;;  %v273_v49 = vsel %vm1068_vm4, %v269_v34, 0  ;;  %v675_v50 = vsel %vm1068_vm4, 1.0, %v901_v2 }
  0x25   : > { %v282_v35 = vmax.f32 %v278_v28, %v281_v29  ;;  %v297_v37 = vmax.f32 %v294_v32, %v296_v33  ;;  %v1084_v56 = vrot.slane %v273_v49, %v407_v46  ;;  %v1086_v57 = vrot.slane %v273_v49, %v411_v47 }
  0x26   : > { %v510_v59 = vadd.f32 %v675_v50, %v507_v52  ;;  %v1111_v2 = vadd.s32 32, %v1066_v40 }
  0x27   : > { %v283_v38 = vmax.f32 %v282_v35, %v279_v31  ;;  %v298_v39 = vmax.f32 %v297_v37, %v295_v36 }
  0x28   : > { %511 = vst.msk [vmem:[%s997_s30] sm:$0x3] %vm985_vm0, %v510_v59  ;;  %s795_s30 = scalar_lea.vmem %s794_s6, 64 }
  0x29   : > { %v284_v41 = vrot.slane %v283_v38, 4  ;;  %v299_v42 = vrot.slane %v298_v39, 4  ;;  %p797_p2 = scmp.lt.s32.totalorder %s795_s30, %s789_s4 }
  0x2b   : > { %v285_v44 = vmax.f32 %v283_v38, %v284_v41  ;;  %v300_v45 = vmax.f32 %v298_v39, %v299_v42  ;;  %p798_p3 = por %p797_p2, %p796_p1 }
  0x2d   : > { %v286_v48 = vrot.slane %v285_v44, 2  ;;  %v301_v51 = vrot.slane %v300_v45, 2  ;;  %p799_p5 = pnand %p798_p3, %p792_p0 }
  0x2f   : > { %v287_v53 = vmax.f32 %v285_v44, %v286_v48  ;;  %v302_v54 = vmax.f32 %v300_v45, %v301_v51 }
  0x31   : > { %v288_v58 = vrot.slane %v287_v53, 1  ;;  %v303_v60 = vrot.slane %v302_v54, 1 }
  0x33   : > { %v1097_v61 = vmax.f32 %v287_v53, %v288_v58  ;;  %v1108_v0 = vmax.f32 %v302_v54, %v303_v60 }
  0x34   : > { %802 = shalt.err (!%p799_p5)
}
  0x35   : > { %s803_s7 = scalar_lea.hbm %s1093_s27, 32  ;;  %s807_s10 = scalar_lea.hbm %s1320_s3, 64 }
  0x36   : > { %p804_p6 = scmp.ne.s32.totalorder %s1093_s27, %s803_s7  ;;  %p808_p10 = scmp.lt.u32.totalorder %s1093_s27, %s1320_s3 }
  0x37   : > { %p809_p11 = scmp.lt.u32.totalorder %s807_s10, %s803_s7  ;;  %p811_p13 = scmp.lt.u32.totalorder %s803_s7, %s1093_s27 }
  0x38   : > { %p805_p7 = pnand %p804_p6, %p965_p4 }
  0x39   : > { %p810_p12 = por %p809_p11, %p808_p10 }
  0x3a   : > { %p806_p9 = pneg %p805_p7 }
  0x3b   : > { %p812_p0 = por %p811_p13, %p810_p12 }
  0x3d   : > { %p813_p1 = pnand %p812_p0, %p806_p9 }
  0x3f   : > { %816 = shalt.err (!%p813_p1)
}
  0x40   : > { %688 = dma.vmem_to_hbm [thread:$0]  (%p965_p4), %s1095_s19, 32, %s1093_s27, %s518_s28   ;;  %v305_v16 = vsub.f32 %v1006_v3, %v1097_v61  ;;  %vm413_vm5 = vcmp.eq.s32.totalorder %v1066_v40, %v1084_v56  ;;  %vm414_vm6 = vcmp.eq.s32.totalorder %v1066_v40, %v1086_v57  ;;  %vm415_vm7 = vcmp.eq.s32.totalorder %v1082_v55, %v1084_v56 }
  0x41   : > { %v306_v20 = vsub.f32 %v1008_v4, %v1108_v0  ;;  %v307_v21 = vsub.f32 %v1010_v5, %v1097_v61  ;;  %v308_v25 = vsub.f32 %v1012_v6, %v1108_v0  ;;  %vm416_vm8 = vcmp.eq.s32.totalorder %v1082_v55, %v1086_v57  ;;  %s532_s19 = sshll.u32 %s992_s29, 4  ;;  %s1266_s28 = scalar_lea.hbm %s1319_s2, %s684_s18  ;;  %s1268_s19 = int_to_ptr.vmem [resolvable:$true] %s532_s19 }
  0x42   : > { %v309_v26 = vsub.f32 %v1014_v7, %v1097_v61  ;;  %vm417_vm9 = vcmp.eq.s32.totalorder %v1100_v62, %v1084_v56  ;;  %vm418_vm10 = vcmp.eq.s32.totalorder %v1100_v62, %v1086_v57  ;;  %vm419_vm11 = vcmp.eq.s32.totalorder %v1103_v63, %v1084_v56  ;;  %s513_s4 = scalar_lea.sflag [#allocation3], %s981_s26  ;;  %s817_s5 = scalar_lea.vmem %s1268_s19, 32 }
  0x43   : > { %v310_v28 = vsub.f32 %v1017_v8, %v1108_v0  ;;  %vm420_vm12 = vcmp.eq.s32.totalorder %v1103_v63, %v1086_v57  ;;  %v431_v29 = vsel %vm413_vm5, %v1006_v3, 0.0  ;;  %v432_v30 = vsel %vm414_vm6, %v1008_v4, 0.0  ;;  %p818_p2 = scmp.ne.s32.totalorder %s1268_s19, %s817_s5  ;;  %s904_s15 = smov [#allocation2]  }
  0x44   : > { %v311_v31 = vsub.f32 %v1019_v9, %v1097_v61  ;;  %v323_v32 = vmul.f32 1.442695, %v305_v16  ;;  %v325_v33 = vmul.f32 1.442695, %v306_v20  ;;  %v433_v34 = vsel %vm415_vm7, %v1010_v5, 0.0  ;;  %s821_s6 = sshll.u32 %s904_s15, 4  ;;  %s822_s6 = int_to_ptr.vmem [resolvable:$false] %s821_s6 }
  0x45   : > { %v312_v35 = vsub.f32 %v1021_v10, %v1108_v0  ;;  %v327_v36 = vmul.f32 1.442695, %v307_v21  ;;  %v329_v37 = vmul.f32 1.442695, %v308_v25  ;;  %vm421_vm13 = vcmp.eq.s32.totalorder %v1111_v2, %v1084_v56  ;;  %p819_p3 = pnand %p818_p2, %p965_p4  ;;  %s823_s30 = scalar_lea.vmem %s822_s6, 64 }
  0x46   : > { %v434_v3 = vsel %vm416_vm8, %v1012_v6, 0.0  ;;  %v313_v4 = vsub.f32 %v1025_v12, %v1097_v61  ;;  %749 = vpow2.f32 %v323_v32  ;;  %v331_v38 = vmul.f32 1.442695, %v309_v26  ;;  %p824_p6 = scmp.lt.s32.totalorder %s1268_s19, %s822_s6  ;;  %p825_p7 = scmp.lt.s32.totalorder %s823_s30, %s817_s5 }
  0x47   : > { %v435_v5 = vsel %vm417_vm9, %v1014_v7, 0.0  ;;  %v314_v39 = vsub.f32 %v1027_v13, %v1108_v0  ;;  %751 = vpow2.f32 %v325_v33  ;;  %v333_v41 = vmul.f32 1.442695, %v310_v28  ;;  %p820_p5 = pneg %p819_p3 }
  0x48   : > { %v449_v42 = vadd.f32 %v433_v34, %v431_v29  ;;  %v315_v44 = vsub.f32 %v1029_v14, %v1097_v61  ;;  %753 = vpow2.f32 %v327_v36  ;;  %v335_v6 = vmul.f32 1.442695, %v311_v31  ;;  %p826_p9 = por %p825_p7, %p824_p6 }
  0x49   : > { %v464_v45 = vadd.f32 %v434_v3, %v432_v30  ;;  %v316_v46 = vsub.f32 %v1035_v17, %v1108_v0  ;;  %755 = vpow2.f32 %v329_v37  ;;  %v337_v47 = vmul.f32 1.442695, %v312_v35 }
  0x4a   : > { %v436_v7 = vsel %vm418_vm10, %v1017_v8, 0.0  ;;  %v317_v48 = vsub.f32 %v1037_v18, %v1097_v61  ;;  %757 = vpow2.f32 %v331_v38  ;;  %v339_v49 = vmul.f32 1.442695, %v313_v4  ;;  %p827_p10 = pnand %p826_p9, %p820_p5 }
  0x4b   : > { %v437_v50 = vsel %vm419_vm11, %v1019_v9, 0.0  ;;  %v318_v51 = vsub.f32 %v1039_v19, %v1108_v0  ;;  %759 = vpow2.f32 %v333_v41  ;;  %v341_v52 = vmul.f32 1.442695, %v314_v39 }
  0x4c   : > { %v450_v53 = vadd.f32 %v449_v42, %v435_v5  ;;  %v319_v54 = vsub.f32 %v1047_v22, %v1097_v61  ;;  %761 = vpow2.f32 %v335_v6  ;;  %v343_v8 = vmul.f32 1.442695, %v315_v44 }
  0x4d   : > { %v465_v55 = vadd.f32 %v464_v45, %v436_v7  ;;  %v320_v58 = vsub.f32 %v1049_v23, %v1108_v0  ;;  %763 = vpow2.f32 %v337_v47  ;;  %v345_v59 = vmul.f32 1.442695, %v316_v46 }
  0x4e   : > { %v438_v9 = vsel %vm420_vm12, %v1021_v10, 0.0  ;;  %v321_v60 = vsub.f32 %v1051_v24, %v1097_v61  ;;  %765 = vpow2.f32 %v339_v49  ;;  %v347_v62 = vmul.f32 1.442695, %v317_v48 }
  0x4f   : > { %vm422_vm14 = vcmp.eq.s32.totalorder %v1111_v2, %v1086_v57  ;;  %v322_v16 = vsub.f32 %v1055_v27, %v1108_v0  ;;  %767 = vpow2.f32 %v341_v52  ;;  %v349_v20 = vmul.f32 1.442695, %v318_v51 }
  0x50   : > { %v451_v21 = vadd.f32 %v450_v53, %v437_v50  ;;  %v750_v25 = vpop.eup %749  ;;  %769 = vpow2.f32 %v343_v8  ;;  %v351_v26 = vmul.f32 1.442695, %v319_v54  ;;  %v439_v10 = vsel %vm421_vm13, %v1025_v12, 0.0 }
  0x51   : > { %v466_v63 = vadd.f32 %v465_v55, %v438_v9  ;;  %v752_v28 = vpop.eup %751  ;;  %771 = vpow2.f32 %v345_v59  ;;  %v353_v29 = vmul.f32 1.442695, %v320_v58  ;;  %vm423_vm15 = vcmp.eq.s32.totalorder %v1114_v11, %v1084_v56 }
  0x52   : > { %v440_v30 = vsel %vm422_vm14, %v1027_v13, 0.0  ;;  %v754_v31 = vpop.eup %753  ;;  %773 = vpow2.f32 %v347_v62  ;;  %v355_v32 = vmul.f32 1.442695, %v321_v60  ;;  %v403_v33 = vadd.s32 56, %v1066_v40 }
  0x53   : > { %vm424_vm2 = vcmp.eq.s32.totalorder %v1114_v11, %v1086_v57  ;;  %v756_v34 = vpop.eup %755  ;;  %775 = vpow2.f32 %v349_v20  ;;  %v357_v12 = vmul.f32 1.442695, %v322_v16  ;;  %v359_v2 = vadd.f32 %v754_v31, %v750_v25 }
  0x54   : > { %v452_v35 = vadd.f32 %v451_v21, %v439_v10  ;;  %v758_v36 = vpop.eup %757  ;;  %777 = vpow2.f32 %v351_v26  ;;  %v374_v37 = vadd.f32 %v756_v34, %v752_v28  ;;  %v441_v3 = vsel %vm423_vm15, %v1029_v14, 0.0 }
  0x55   : > { %v467_v4 = vadd.f32 %v466_v63, %v440_v30  ;;  %v760_v13 = vpop.eup %759  ;;  %779 = vpow2.f32 %v353_v29  ;;  %v360_v38 = vadd.f32 %v758_v36, %v359_v2  ;;  %vm425_vm3 = vcmp.eq.s32.totalorder %v1117_v15, %v1084_v56 }
  0x56   : > { %v442_v5 = vsel %vm424_vm2, %v1035_v17, 0.0  ;;  %v762_v11 = vpop.eup %761  ;;  %781 = vpow2.f32 %v355_v32  ;;  %v375_v39 = vadd.f32 %v760_v13, %v374_v37  ;;  %v404_v41 = vadd.s32 64, %v1066_v40 }
  0x57   : > { %vm426_vm5 = vcmp.eq.s32.totalorder %v1117_v15, %v1086_v57  ;;  %v764_v42 = vpop.eup %763  ;;  %783 = vpow2.f32 %v357_v12  ;;  %v361_v14 = vadd.f32 %v762_v11, %v360_v38  ;;  %v453_v44 = vadd.f32 %v452_v35, %v441_v3 }
  0x58   : > { %v766_v6 = vpop.eup %765  ;;  %v376_v45 = vadd.f32 %v764_v42, %v375_v39  ;;  %v443_v46 = vsel %vm425_vm3, %v1037_v18, 0.0  ;;  %v468_v47 = vadd.f32 %v467_v4, %v442_v5  ;;  %vm427_vm6 = vcmp.eq.s32.totalorder %v403_v33, %v1084_v56 }
  0x59   : > { %v768_v7 = vpop.eup %767  ;;  %v362_v48 = vadd.f32 %v766_v6, %v361_v14  ;;  %v444_v17 = vsel %vm426_vm5, %v1039_v19, 0.0  ;;  %vm428_vm7 = vcmp.eq.s32.totalorder %v403_v33, %v1086_v57  ;;  %vm429_vm8 = vcmp.eq.s32.totalorder %v404_v41, %v1084_v56 }
  0x5a   : > { %v770_v49 = vpop.eup %769  ;;  %v377_v50 = vadd.f32 %v768_v7, %v376_v45  ;;  %vm430_vm9 = vcmp.eq.s32.totalorder %v404_v41, %v1086_v57  ;;  %v454_v52 = vadd.f32 %v453_v44, %v443_v46  ;;  %v445_v54 = vsel %vm427_vm6, %v1047_v22, 0.0 }
  0x5b   : > { %v772_v15 = vpop.eup %771  ;;  %v363_v51 = vadd.f32 %v770_v49, %v362_v48  ;;  %v469_v8 = vadd.f32 %v468_v47, %v444_v17  ;;  %v446_v19 = vsel %vm428_vm7, %v1049_v23, 0.0  ;;  %v447_v59 = vsel %vm429_vm8, %v1051_v24, 0.0 }
  0x5c   : > { %v774_v53 = vpop.eup %773  ;;  %v378_v18 = vadd.f32 %v772_v15, %v377_v50  ;;  %v448_v56 = vsel %vm430_vm9, %v1055_v27, 0.0  ;;  %v455_v20 = vadd.f32 %v454_v52, %v445_v54  ;;  %v456_v25 = vsel %vm280_vm1, %v447_v59, 0.0 }
  0x5d   : > { %v776_v55 = vpop.eup %775  ;;  %v364_v58 = vadd.f32 %v774_v53, %v363_v51  ;;  %v470_v26 = vadd.f32 %v469_v8, %v446_v19  ;;  %v471_v63 = vsel %vm280_vm1, %v448_v56, 0.0  ;;  %v903_v45 = vmov 1966171168  }
  0x5e   : > { %v778_v9 = vpop.eup %777  ;;  %v379_v60 = vadd.f32 %v776_v55, %v378_v18  ;;  %v457_v29 = vadd.f32 %v456_v25, %v455_v20  ;;  %v486_v46 = vunpack.c.l.s4 %v903_v45 }
  0x5f   : > { %v780_v62 = vpop.eup %779  ;;  %v365_v16 = vadd.f32 %v778_v9, %v364_v58  ;;  %v472_v27 = vadd.f32 %v471_v63, %v470_v26  ;;  %v481_v58 = vld [vmem:[%s992_s29] sm:$0x3] }
  0x60   : > { %v782_v57 = vpop.eup %781  ;;  %v380_v21 = vadd.f32 %v780_v62, %v379_v60  ;;  %v458_v34 = vrot.slane %v457_v29, 4  ;;  %v487_v15 = vunpack.c.0.s8 %v486_v46 }
  0x61   : > { %v784_v22 = vpop.eup %783  ;;  %v366_v10 = vsel %vm280_vm1, %v782_v57, 0.0  ;;  %v473_v2 = vrot.slane %v472_v27, 4 }
  0x62   : > { %v367_v23 = vadd.f32 %v366_v10, %v365_v16  ;;  %v381_v24 = vsel %vm280_vm1, %v784_v22, 0.0  ;;  %v459_v3 = vadd.f32 %v458_v34, %v457_v29  ;;  %v490_v54 = vsub.s32 %v487_v15, %v1066_v40 }
  0x63   : > { %v382_v28 = vadd.f32 %v381_v24, %v380_v21  ;;  %v474_v13 = vadd.f32 %v473_v2, %v472_v27 }
  0x64   : > { %v368_v30 = vrot.slane %v367_v23, 4  ;;  %v460_v39 = vrot.slane %v459_v3, 2 }
  0x65   : > { %v383_v31 = vrot.slane %v382_v28, 4  ;;  %v475_v41 = vrot.slane %v474_v13, 2 }
  0x66   : > { %v369_v32 = vadd.f32 %v368_v30, %v367_v23  ;;  %v461_v42 = vadd.f32 %v460_v39, %v459_v3 }
  0x67   : > { %v384_v33 = vadd.f32 %v383_v31, %v382_v28  ;;  %v476_v14 = vadd.f32 %v475_v41, %v474_v13 }
  0x68   : > { %v370_v12 = vrot.slane %v369_v32, 2  ;;  %v462_v44 = vrot.slane %v461_v42, 1 }
  0x69   : > { %v385_v35 = vrot.slane %v384_v33, 2  ;;  %v477_v6 = vrot.slane %v476_v14, 1 }
  0x6a   : > { %v371_v36 = vadd.f32 %v370_v12, %v369_v32  ;;  %v463_v17 = vadd.f32 %v462_v44, %v461_v42 }
  0x6b   : > { %v386_v37 = vadd.f32 %v385_v35, %v384_v33  ;;  %v478_v50 = vadd.f32 %v477_v6, %v476_v14 }
  0x6c   : > { %v372_v4 = vrot.slane %v371_v36, 1 }
  0x6d   : > { %v387_v38 = vrot.slane %v386_v37, 1 }
  0x6e   : > { %v373_v5 = vadd.f32 %v372_v4, %v371_v36 }
  0x6f   : > { %v388_v11 = vadd.f32 %v387_v38, %v386_v37 }
  0x70   : > { %785 = vlog2.f32 %v373_v5 }
  0x71   : > { %787 = vlog2.f32 %v388_v11 }
  0x7a   : > { %v786_v47 = vpop.eup %785 }
  0x7b   : > { %v788_v7 = vpop.eup %787  ;;  %v390_v48 = vmul.f32 0.6931472, %v786_v47 }
  0x7c   : > { %v392_v49 = vmul.f32 0.6931472, %v788_v7 }
  0x7d   : > { %v393_v51 = vadd.f32 %v390_v48, %v1097_v61 }
  0x7e   : > { %v394_v52 = vadd.f32 %v392_v49, %v1108_v0 }
  0x7f   : > { %v479_v53 = vsub.f32 %v393_v51, %v463_v17 }
  0x80   : > { %v480_v18 = vsub.f32 %v394_v52, %v478_v50 }
  0x82   : > { %v484_v8 = vcombine.low %v479_v53, %v480_v18 }
  0x84   : > { %v491_v55 = vrot.slane %v484_v8, %v490_v54 }
  0x86   : > { %v498_v19 = vrot.slane %v491_v55, %v490_v54 }
  0x88   : > { %v500_v59 = vsel %vm1068_vm4, %v498_v19, 0.0 }
  0x89   : > { %v501_v9 = vadd.f32 %v500_v59, %v481_v58 }
  0x8b   : > { %506 = vst.msk [vmem:[%s992_s29] sm:$0x3] %vm985_vm0, %v501_v9 }
  0x8c   : > { %830 = shalt.err (!%p827_p10)
}
  0x8d   : > { %s831_s26 = scalar_lea.hbm %s1266_s28, 32  ;;  %s835_s7 = scalar_lea.hbm %s1319_s2, 64 }
  0x8e   : > { %p832_p11 = scmp.ne.s32.totalorder %s1266_s28, %s831_s26  ;;  %p836_p0 = scmp.lt.u32.totalorder %s1266_s28, %s1319_s2 }
  0x8f   : > { %p837_p1 = scmp.lt.u32.totalorder %s835_s7, %s831_s26  ;;  %p839_p3 = scmp.lt.u32.totalorder %s831_s26, %s1266_s28 }
  0x90   : > { %p833_p12 = pnand %p832_p11, %p965_p4 }
  0x91   : > { %p838_p2 = por %p837_p1, %p836_p0 }
  0x92   : > { %p834_p13 = pneg %p833_p12 }
  0x93   : > { %p840_p5 = por %p839_p3, %p838_p2 }
  0x95   : > { %p841_p6 = pnand %p840_p5, %p834_p13 }
  0x97   : > { %844 = shalt.err (!%p841_p6)
}
  0x98   : > { %687 = dma.vmem_to_hbm [thread:$0]  (%p965_p4), %s1268_s19, 32, %s1266_s28, %s513_s4  }
  0x99 PF: > { %p698_p7 = scmp.ge.s32.totalorder %s899_s17, 2  ;;  %s558_s10 = sand.u32 1, %s879_s12  }
  0x9a   : > { %s559_s11 = scalar_lea.sflag [#allocation3], %s558_s10 }
  0x9b   : > { %p692_p9 = pnand %p698_p7, %p972_p8 }
  0x9d   : > { %870 = dma.done.wait (!%p692_p9), %s559_s11, 32  }
  0x9e   : > { %872 = vsyncadd (!%p692_p9), %s559_s11, 4294967264  ;;  %s568_s21 = scalar_lea.sflag [#allocation5], %s558_s10 }
  0x9f   : > { %874 = dma.done.wait (!%p692_p9), %s568_s21, 32  }
  0xa0   : > { %876 = vsyncadd (!%p692_p9), %s568_s21, 4294967264  ;;  %s20_s17 = sadd.s32 1, %s899_s17   ;;  %s1327_s12 = smov %s883_s13 }
  0xa1   : > { %p17_p10 = scmp.ge.s32.totalorder %s20_s17, 4   ;;  %s1328_s13 = smov %s887_s14 }
  0xa2   : > { %s1329_s14 = smov %s978_s25  ;;  %s1330_s15 = smov %s895_s16 }
  0xa3   : > { %s1331_s16 = smov %s1333_s20  ;;  %19 = sbr.rel (!%p17_p10) target bundleno = 6 (0x6), region = 87 }
  0xaa   :  { %573 = vsyncpa [#allocation3], 1 }
  0xab   :  { %575 = vsyncpa [#allocation3 + $0x1], 1 }
  0xac   :  { %576 = vsyncpa [#allocation5], 1 }
  0xad   :  { %578 = vsyncpa [#allocation5 + $0x1], 1 }

</bundles_post_ra>
